<compile_context>
chip_gen: v6e
topology: v6e:2x2x1
jax: 0.10.0
libtpu: 0.0.40
codegen_flags: <defaults>
</compile_context>

<pallas_src>
import functools

import jax
import jax.numpy as jnp
from jax.experimental import pallas as pl
from jax.experimental.pallas import tpu as pltpu


def _bise_kernel(w_ref, b_ref, p_ref, x_ref, o_ref, *, H, W, KH, KW, C_out):
    """One grid point = one batch element n; all C_out channels computed here.

    w_ref : SMEM (C_out*KH*KW,)   normalized (sigmoid'd) conv weights, flattened
    b_ref : SMEM (C_out,)         effective bias = -softplus(raw_bias) - 0.5
    p_ref : SMEM (C_out,)         activation P (per channel)
    x_ref : VMEM (1, H+2p, W+2p)  replicate-padded input for batch n
    o_ref : VMEM (1, C_out, H*W)  lane-dense output block for batch n
    """
    xp = x_ref[0]  # (H+2p, W+2p)

    # Hoist the KH*KW shifted slices: emitted once per grid step, reused by every
    # output channel (amortizes the cross-lane/sublane shifts C_out-fold).
    shifted = []
    for di in range(KH):
        for dj in range(KW):
            shifted.append(xp[di:di + H, dj:dj + W])  # (H, W), static slices

    outs = []
    for c in range(C_out):
        acc = jnp.zeros((H, W), jnp.float32)
        # K x K cross-correlation (PyTorch conv2d does NOT flip the kernel).
        for t in range(KH * KW):
            acc = acc + w_ref[c * (KH * KW) + t] * shifted[t]
        z = p_ref[c] * (acc + b_ref[c])
        # sigmoid(z) == 0.5 * tanh(0.5 * z) + 0.5  (one EUP tanh + one VPU FMA)
        outs.append(0.5 * jnp.tanh(0.5 * z) + 0.5)

    out = jnp.stack(outs, axis=0)           # (C_out, H, W)
    # Single lane-dense store: (C_out, H*W) with H*W a multiple of 128.
    o_ref[0] = out.reshape(C_out, H * W)


def bise_forward(x, conv_weight, raw_bias, weight_P, activation_P, kernel_size):
    """x: (N, 1, H, W) f32.  conv_weight: (C_out, 1, KH, KW).  Returns (N, C_out, H, W)."""
    N, Cin, H, W = x.shape
    assert Cin == 1, "BiSE has in_channels=1"
    C_out = conv_weight.shape[0]
    KH, KW = kernel_size
    # The PyTorch module uses padding = kernel_size[0] // 2 on both dims; only
    # square odd kernels give 'same' output shapes, so we require that here.
    assert KH == KW and KH % 2 == 1, "BiSE assumes square odd kernel sizes"
    p = KH // 2

    # ---- parameter setup (glue, plain JAX) ----
    # normalized weights: sigmoid(weight_P[c] * W[c, 0])   (axis_channels=0)
    w_norm = jax.nn.sigmoid(weight_P[:, None, None] * conv_weight[:, 0, :, :])
    w_flat = w_norm.reshape(-1).astype(jnp.float32)          # (C_out*KH*KW,)
    # effective bias: -softplus(raw_bias) - 0.5
    bias_eff = (-jax.nn.softplus(raw_bias) - 0.5).astype(jnp.float32)  # (C_out,)
    act_P = activation_P.astype(jnp.float32)                  # (C_out,)

    # replicate padding ('edge') on spatial dims (glue).  At large H,W the border
    # handling would move inside the kernel to avoid an extra HBM pass.
    x_pad = jnp.pad(x[:, 0, :, :], ((0, 0), (p, p), (p, p)), mode="edge")
    Hp, Wp = H + 2 * p, W + 2 * p
    HW = H * W

    kernel = functools.partial(_bise_kernel, H=H, W=W, KH=KH, KW=KW, C_out=C_out)

    grid_spec = pltpu.PrefetchScalarGridSpec(
        num_scalar_prefetch=0,
        grid=(N,),
        in_specs=[
            pl.BlockSpec(memory_space=pltpu.MemorySpace.SMEM),   # w_flat
            pl.BlockSpec(memory_space=pltpu.MemorySpace.SMEM),   # bias_eff
            pl.BlockSpec(memory_space=pltpu.MemorySpace.SMEM),   # act_P
            pl.BlockSpec((1, Hp, Wp), lambda n: (n, 0, 0)),      # padded input
        ],
        out_specs=pl.BlockSpec((1, C_out, HW), lambda n: (n, 0, 0)),
    )

    out_flat = pl.pallas_call(
        kernel,
        out_shape=jax.ShapeDtypeStruct((N, C_out, HW), jnp.float32),
        grid_spec=grid_spec,
        compiler_params=pltpu.CompilerParams(
            dimension_semantics=("parallel",)),
    )(w_flat, bias_eff, act_P, x_pad)

    return out_flat.reshape(N, C_out, H, W)


def _reference_forward(x, conv_weight, raw_bias, weight_P, activation_P, kernel_size):
    """Pure-JAX reference mirroring the PyTorch module (for verification)."""
    KH, KW = kernel_size
    p = KH // 2
    w_norm = jax.nn.sigmoid(weight_P[:, None, None, None] * conv_weight)  # (C_out,1,KH,KW)
    bias_eff = -jax.nn.softplus(raw_bias) - 0.5
    x_pad = jnp.pad(x, ((0, 0), (0, 0), (p, p), (p, p)), mode="edge")
    y = jax.lax.conv_general_dilated(
        x_pad, w_norm, window_strides=(1, 1), padding="VALID",
        dimension_numbers=("NCHW", "OIHW", "NCHW"))
    y = y + bias_eff[None, :, None, None]
    return jax.nn.sigmoid(activation_P[None, :, None, None] * y)


if __name__ == "__main__":
    # Small shapes consistent with the module: batch=2, in_channels=1 (required),
    # out_channels=4, spatial 16x16, kernel_size=3.
    N, H, W = 2, 16, 16
    C_out = 4
    kernel_size = (3, 3)

    key = jax.random.PRNGKey(0)
    kx, kw = jax.random.split(key)

    x = jax.random.uniform(kx, (N, 1, H, W), dtype=jnp.float32)

    # init_weight_mode='normal_identity': randn * 0.3 - 1, center tap += 2
    w = jax.random.normal(kw, (C_out,) + kernel_size, dtype=jnp.float32) * 0.3 - 1.0
    w = w.at[:, kernel_size[0] // 2, kernel_size[1] // 2].add(2.0)
    conv_weight = w[:, None, :, :]                           # (C_out, 1, KH, KW)

    raw_bias = jnp.full((C_out,), -2.0, dtype=jnp.float32)   # init_bias_value = -2
    weight_P = jnp.ones((C_out,), dtype=jnp.float32)         # weight_P = 1
    activation_P = jnp.full((C_out,), 10.0, dtype=jnp.float32)  # activation_P = 10

    out = bise_forward(x, conv_weight, raw_bias, weight_P, activation_P, kernel_size)
    out = jax.block_until_ready(out)

    ref = _reference_forward(x, conv_weight, raw_bias, weight_P, activation_P, kernel_size)
    assert out.shape == (N, C_out, H, W)
    assert jnp.allclose(out, ref, atol=1e-5, rtol=1e-5), "mismatch vs reference"

    print("KERNEL_OK")
</pallas_src>

<mosaic_0001>
module attributes {stable_mosaic.version = 11 : i64} {
  func.func @_bise_kernel(%arg0: i32, %arg1: memref<36xf32, #tpu.memory_space<smem>>, %arg2: memref<4xf32, #tpu.memory_space<smem>>, %arg3: memref<4xf32, #tpu.memory_space<smem>>, %arg4: memref<1x18x18xf32, #tpu.memory_space<vmem>>, %arg5: memref<1x4x256xf32, #tpu.memory_space<vmem>>) attributes {dimension_semantics = [#tpu.dimension_semantics<parallel>], iteration_bounds = array<i64: 2>, scalar_prefetch = 0 : i64, scratch_operands = 0 : i64, tpu.core_type = #tpu.core_type<tc>, window_params = [{transform_indices = @transform_0, window_bounds = array<i64: 36>}, {transform_indices = @transform_1, window_bounds = array<i64: 4>}, {transform_indices = @transform_2, window_bounds = array<i64: 4>}, {transform_indices = @transform_3, window_bounds = array<i64: 1, 18, 18>}, {transform_indices = @transform_4, window_bounds = array<i64: 1, 4, 256>}]} {
    %c0 = arith.constant 0 : index
    %c0_0 = arith.constant 0 : index
    %c0_1 = arith.constant 0 : index
    %0 = vector.load %arg4[%c0, %c0_0, %c0_1] : memref<1x18x18xf32, #tpu.memory_space<vmem>>, vector<1x18x18xf32>
    %1 = vector.shape_cast %0 : vector<1x18x18xf32> to vector<18x18xf32>
    %2 = vector.extract_strided_slice %1 {offsets = [0, 0], sizes = [16, 16], strides = [1, 1]} : vector<18x18xf32> to vector<16x16xf32>
    %3 = vector.extract_strided_slice %1 {offsets = [0, 1], sizes = [16, 16], strides = [1, 1]} : vector<18x18xf32> to vector<16x16xf32>
    %4 = vector.extract_strided_slice %1 {offsets = [0, 2], sizes = [16, 16], strides = [1, 1]} : vector<18x18xf32> to vector<16x16xf32>
    %5 = vector.extract_strided_slice %1 {offsets = [1, 0], sizes = [16, 16], strides = [1, 1]} : vector<18x18xf32> to vector<16x16xf32>
    %6 = vector.extract_strided_slice %1 {offsets = [1, 1], sizes = [16, 16], strides = [1, 1]} : vector<18x18xf32> to vector<16x16xf32>
    %7 = vector.extract_strided_slice %1 {offsets = [1, 2], sizes = [16, 16], strides = [1, 1]} : vector<18x18xf32> to vector<16x16xf32>
    %8 = vector.extract_strided_slice %1 {offsets = [2, 0], sizes = [16, 16], strides = [1, 1]} : vector<18x18xf32> to vector<16x16xf32>
    %9 = vector.extract_strided_slice %1 {offsets = [2, 1], sizes = [16, 16], strides = [1, 1]} : vector<18x18xf32> to vector<16x16xf32>
    %10 = vector.extract_strided_slice %1 {offsets = [2, 2], sizes = [16, 16], strides = [1, 1]} : vector<18x18xf32> to vector<16x16xf32>
    %cst = arith.constant 0.000000e+00 : f32
    %11 = vector.broadcast %cst : f32 to vector<16x16xf32>
    %c0_2 = arith.constant 0 : index
    %12 = memref.load %arg1[%c0_2] : memref<36xf32, #tpu.memory_space<smem>>
    %13 = vector.broadcast %12 : f32 to vector<16x16xf32>
    %14 = arith.mulf %13, %2 : vector<16x16xf32>
    %15 = arith.addf %11, %14 : vector<16x16xf32>
    %c1 = arith.constant 1 : index
    %16 = memref.load %arg1[%c1] : memref<36xf32, #tpu.memory_space<smem>>
    %17 = vector.broadcast %16 : f32 to vector<16x16xf32>
    %18 = arith.mulf %17, %3 : vector<16x16xf32>
    %19 = arith.addf %15, %18 : vector<16x16xf32>
    %c2 = arith.constant 2 : index
    %20 = memref.load %arg1[%c2] : memref<36xf32, #tpu.memory_space<smem>>
    %21 = vector.broadcast %20 : f32 to vector<16x16xf32>
    %22 = arith.mulf %21, %4 : vector<16x16xf32>
    %23 = arith.addf %19, %22 : vector<16x16xf32>
    %c3 = arith.constant 3 : index
    %24 = memref.load %arg1[%c3] : memref<36xf32, #tpu.memory_space<smem>>
    %25 = vector.broadcast %24 : f32 to vector<16x16xf32>
    %26 = arith.mulf %25, %5 : vector<16x16xf32>
    %27 = arith.addf %23, %26 : vector<16x16xf32>
    %c4 = arith.constant 4 : index
    %28 = memref.load %arg1[%c4] : memref<36xf32, #tpu.memory_space<smem>>
    %29 = vector.broadcast %28 : f32 to vector<16x16xf32>
    %30 = arith.mulf %29, %6 : vector<16x16xf32>
    %31 = arith.addf %27, %30 : vector<16x16xf32>
    %c5 = arith.constant 5 : index
    %32 = memref.load %arg1[%c5] : memref<36xf32, #tpu.memory_space<smem>>
    %33 = vector.broadcast %32 : f32 to vector<16x16xf32>
    %34 = arith.mulf %33, %7 : vector<16x16xf32>
    %35 = arith.addf %31, %34 : vector<16x16xf32>
    %c6 = arith.constant 6 : index
    %36 = memref.load %arg1[%c6] : memref<36xf32, #tpu.memory_space<smem>>
    %37 = vector.broadcast %36 : f32 to vector<16x16xf32>
    %38 = arith.mulf %37, %8 : vector<16x16xf32>
    %39 = arith.addf %35, %38 : vector<16x16xf32>
    %c7 = arith.constant 7 : index
    %40 = memref.load %arg1[%c7] : memref<36xf32, #tpu.memory_space<smem>>
    %41 = vector.broadcast %40 : f32 to vector<16x16xf32>
    %42 = arith.mulf %41, %9 : vector<16x16xf32>
    %43 = arith.addf %39, %42 : vector<16x16xf32>
    %c8 = arith.constant 8 : index
    %44 = memref.load %arg1[%c8] : memref<36xf32, #tpu.memory_space<smem>>
    %45 = vector.broadcast %44 : f32 to vector<16x16xf32>
    %46 = arith.mulf %45, %10 : vector<16x16xf32>
    %47 = arith.addf %43, %46 : vector<16x16xf32>
    %c0_3 = arith.constant 0 : index
    %48 = memref.load %arg3[%c0_3] : memref<4xf32, #tpu.memory_space<smem>>
    %c0_4 = arith.constant 0 : index
    %49 = memref.load %arg2[%c0_4] : memref<4xf32, #tpu.memory_space<smem>>
    %50 = vector.broadcast %49 : f32 to vector<16x16xf32>
    %51 = arith.addf %47, %50 : vector<16x16xf32>
    %52 = vector.broadcast %48 : f32 to vector<16x16xf32>
    %53 = arith.mulf %52, %51 : vector<16x16xf32>
    %cst_5 = arith.constant 5.000000e-01 : f32
    %54 = vector.broadcast %cst_5 : f32 to vector<16x16xf32>
    %55 = arith.mulf %54, %53 : vector<16x16xf32>
    %56 = math.tanh %55 : vector<16x16xf32>
    %cst_6 = arith.constant 5.000000e-01 : f32
    %57 = vector.broadcast %cst_6 : f32 to vector<16x16xf32>
    %58 = arith.mulf %57, %56 : vector<16x16xf32>
    %cst_7 = arith.constant 5.000000e-01 : f32
    %59 = vector.broadcast %cst_7 : f32 to vector<16x16xf32>
    %60 = arith.addf %58, %59 : vector<16x16xf32>
    %cst_8 = arith.constant 0.000000e+00 : f32
    %61 = vector.broadcast %cst_8 : f32 to vector<16x16xf32>
    %c9 = arith.constant 9 : index
    %62 = memref.load %arg1[%c9] : memref<36xf32, #tpu.memory_space<smem>>
    %63 = vector.broadcast %62 : f32 to vector<16x16xf32>
    %64 = arith.mulf %63, %2 : vector<16x16xf32>
    %65 = arith.addf %61, %64 : vector<16x16xf32>
    %c10 = arith.constant 10 : index
    %66 = memref.load %arg1[%c10] : memref<36xf32, #tpu.memory_space<smem>>
    %67 = vector.broadcast %66 : f32 to vector<16x16xf32>
    %68 = arith.mulf %67, %3 : vector<16x16xf32>
    %69 = arith.addf %65, %68 : vector<16x16xf32>
    %c11 = arith.constant 11 : index
    %70 = memref.load %arg1[%c11] : memref<36xf32, #tpu.memory_space<smem>>
    %71 = vector.broadcast %70 : f32 to vector<16x16xf32>
    %72 = arith.mulf %71, %4 : vector<16x16xf32>
    %73 = arith.addf %69, %72 : vector<16x16xf32>
    %c12 = arith.constant 12 : index
    %74 = memref.load %arg1[%c12] : memref<36xf32, #tpu.memory_space<smem>>
    %75 = vector.broadcast %74 : f32 to vector<16x16xf32>
    %76 = arith.mulf %75, %5 : vector<16x16xf32>
    %77 = arith.addf %73, %76 : vector<16x16xf32>
    %c13 = arith.constant 13 : index
    %78 = memref.load %arg1[%c13] : memref<36xf32, #tpu.memory_space<smem>>
    %79 = vector.broadcast %78 : f32 to vector<16x16xf32>
    %80 = arith.mulf %79, %6 : vector<16x16xf32>
    %81 = arith.addf %77, %80 : vector<16x16xf32>
    %c14 = arith.constant 14 : index
    %82 = memref.load %arg1[%c14] : memref<36xf32, #tpu.memory_space<smem>>
    %83 = vector.broadcast %82 : f32 to vector<16x16xf32>
    %84 = arith.mulf %83, %7 : vector<16x16xf32>
    %85 = arith.addf %81, %84 : vector<16x16xf32>
    %c15 = arith.constant 15 : index
    %86 = memref.load %arg1[%c15] : memref<36xf32, #tpu.memory_space<smem>>
    %87 = vector.broadcast %86 : f32 to vector<16x16xf32>
    %88 = arith.mulf %87, %8 : vector<16x16xf32>
    %89 = arith.addf %85, %88 : vector<16x16xf32>
    %c16 = arith.constant 16 : index
    %90 = memref.load %arg1[%c16] : memref<36xf32, #tpu.memory_space<smem>>
    %91 = vector.broadcast %90 : f32 to vector<16x16xf32>
    %92 = arith.mulf %91, %9 : vector<16x16xf32>
    %93 = arith.addf %89, %92 : vector<16x16xf32>
    %c17 = arith.constant 17 : index
    %94 = memref.load %arg1[%c17] : memref<36xf32, #tpu.memory_space<smem>>
    %95 = vector.broadcast %94 : f32 to vector<16x16xf32>
    %96 = arith.mulf %95, %10 : vector<16x16xf32>
    %97 = arith.addf %93, %96 : vector<16x16xf32>
    %c1_9 = arith.constant 1 : index
    %98 = memref.load %arg3[%c1_9] : memref<4xf32, #tpu.memory_space<smem>>
    %c1_10 = arith.constant 1 : index
    %99 = memref.load %arg2[%c1_10] : memref<4xf32, #tpu.memory_space<smem>>
    %100 = vector.broadcast %99 : f32 to vector<16x16xf32>
    %101 = arith.addf %97, %100 : vector<16x16xf32>
    %102 = vector.broadcast %98 : f32 to vector<16x16xf32>
    %103 = arith.mulf %102, %101 : vector<16x16xf32>
    %cst_11 = arith.constant 5.000000e-01 : f32
    %104 = vector.broadcast %cst_11 : f32 to vector<16x16xf32>
    %105 = arith.mulf %104, %103 : vector<16x16xf32>
    %106 = math.tanh %105 : vector<16x16xf32>
    %cst_12 = arith.constant 5.000000e-01 : f32
    %107 = vector.broadcast %cst_12 : f32 to vector<16x16xf32>
    %108 = arith.mulf %107, %106 : vector<16x16xf32>
    %cst_13 = arith.constant 5.000000e-01 : f32
    %109 = vector.broadcast %cst_13 : f32 to vector<16x16xf32>
    %110 = arith.addf %108, %109 : vector<16x16xf32>
    %cst_14 = arith.constant 0.000000e+00 : f32
    %111 = vector.broadcast %cst_14 : f32 to vector<16x16xf32>
    %c18 = arith.constant 18 : index
    %112 = memref.load %arg1[%c18] : memref<36xf32, #tpu.memory_space<smem>>
    %113 = vector.broadcast %112 : f32 to vector<16x16xf32>
    %114 = arith.mulf %113, %2 : vector<16x16xf32>
    %115 = arith.addf %111, %114 : vector<16x16xf32>
    %c19 = arith.constant 19 : index
    %116 = memref.load %arg1[%c19] : memref<36xf32, #tpu.memory_space<smem>>
    %117 = vector.broadcast %116 : f32 to vector<16x16xf32>
    %118 = arith.mulf %117, %3 : vector<16x16xf32>
    %119 = arith.addf %115, %118 : vector<16x16xf32>
    %c20 = arith.constant 20 : index
    %120 = memref.load %arg1[%c20] : memref<36xf32, #tpu.memory_space<smem>>
    %121 = vector.broadcast %120 : f32 to vector<16x16xf32>
    %122 = arith.mulf %121, %4 : vector<16x16xf32>
    %123 = arith.addf %119, %122 : vector<16x16xf32>
    %c21 = arith.constant 21 : index
    %124 = memref.load %arg1[%c21] : memref<36xf32, #tpu.memory_space<smem>>
    %125 = vector.broadcast %124 : f32 to vector<16x16xf32>
    %126 = arith.mulf %125, %5 : vector<16x16xf32>
    %127 = arith.addf %123, %126 : vector<16x16xf32>
    %c22 = arith.constant 22 : index
    %128 = memref.load %arg1[%c22] : memref<36xf32, #tpu.memory_space<smem>>
    %129 = vector.broadcast %128 : f32 to vector<16x16xf32>
    %130 = arith.mulf %129, %6 : vector<16x16xf32>
    %131 = arith.addf %127, %130 : vector<16x16xf32>
    %c23 = arith.constant 23 : index
    %132 = memref.load %arg1[%c23] : memref<36xf32, #tpu.memory_space<smem>>
    %133 = vector.broadcast %132 : f32 to vector<16x16xf32>
    %134 = arith.mulf %133, %7 : vector<16x16xf32>
    %135 = arith.addf %131, %134 : vector<16x16xf32>
    %c24 = arith.constant 24 : index
    %136 = memref.load %arg1[%c24] : memref<36xf32, #tpu.memory_space<smem>>
    %137 = vector.broadcast %136 : f32 to vector<16x16xf32>
    %138 = arith.mulf %137, %8 : vector<16x16xf32>
    %139 = arith.addf %135, %138 : vector<16x16xf32>
    %c25 = arith.constant 25 : index
    %140 = memref.load %arg1[%c25] : memref<36xf32, #tpu.memory_space<smem>>
    %141 = vector.broadcast %140 : f32 to vector<16x16xf32>
    %142 = arith.mulf %141, %9 : vector<16x16xf32>
    %143 = arith.addf %139, %142 : vector<16x16xf32>
    %c26 = arith.constant 26 : index
    %144 = memref.load %arg1[%c26] : memref<36xf32, #tpu.memory_space<smem>>
    %145 = vector.broadcast %144 : f32 to vector<16x16xf32>
    %146 = arith.mulf %145, %10 : vector<16x16xf32>
    %147 = arith.addf %143, %146 : vector<16x16xf32>
    %c2_15 = arith.constant 2 : index
    %148 = memref.load %arg3[%c2_15] : memref<4xf32, #tpu.memory_space<smem>>
    %c2_16 = arith.constant 2 : index
    %149 = memref.load %arg2[%c2_16] : memref<4xf32, #tpu.memory_space<smem>>
    %150 = vector.broadcast %149 : f32 to vector<16x16xf32>
    %151 = arith.addf %147, %150 : vector<16x16xf32>
    %152 = vector.broadcast %148 : f32 to vector<16x16xf32>
    %153 = arith.mulf %152, %151 : vector<16x16xf32>
    %cst_17 = arith.constant 5.000000e-01 : f32
    %154 = vector.broadcast %cst_17 : f32 to vector<16x16xf32>
    %155 = arith.mulf %154, %153 : vector<16x16xf32>
    %156 = math.tanh %155 : vector<16x16xf32>
    %cst_18 = arith.constant 5.000000e-01 : f32
    %157 = vector.broadcast %cst_18 : f32 to vector<16x16xf32>
    %158 = arith.mulf %157, %156 : vector<16x16xf32>
    %cst_19 = arith.constant 5.000000e-01 : f32
    %159 = vector.broadcast %cst_19 : f32 to vector<16x16xf32>
    %160 = arith.addf %158, %159 : vector<16x16xf32>
    %cst_20 = arith.constant 0.000000e+00 : f32
    %161 = vector.broadcast %cst_20 : f32 to vector<16x16xf32>
    %c27 = arith.constant 27 : index
    %162 = memref.load %arg1[%c27] : memref<36xf32, #tpu.memory_space<smem>>
    %163 = vector.broadcast %162 : f32 to vector<16x16xf32>
    %164 = arith.mulf %163, %2 : vector<16x16xf32>
    %165 = arith.addf %161, %164 : vector<16x16xf32>
    %c28 = arith.constant 28 : index
    %166 = memref.load %arg1[%c28] : memref<36xf32, #tpu.memory_space<smem>>
    %167 = vector.broadcast %166 : f32 to vector<16x16xf32>
    %168 = arith.mulf %167, %3 : vector<16x16xf32>
    %169 = arith.addf %165, %168 : vector<16x16xf32>
    %c29 = arith.constant 29 : index
    %170 = memref.load %arg1[%c29] : memref<36xf32, #tpu.memory_space<smem>>
    %171 = vector.broadcast %170 : f32 to vector<16x16xf32>
    %172 = arith.mulf %171, %4 : vector<16x16xf32>
    %173 = arith.addf %169, %172 : vector<16x16xf32>
    %c30 = arith.constant 30 : index
    %174 = memref.load %arg1[%c30] : memref<36xf32, #tpu.memory_space<smem>>
    %175 = vector.broadcast %174 : f32 to vector<16x16xf32>
    %176 = arith.mulf %175, %5 : vector<16x16xf32>
    %177 = arith.addf %173, %176 : vector<16x16xf32>
    %c31 = arith.constant 31 : index
    %178 = memref.load %arg1[%c31] : memref<36xf32, #tpu.memory_space<smem>>
    %179 = vector.broadcast %178 : f32 to vector<16x16xf32>
    %180 = arith.mulf %179, %6 : vector<16x16xf32>
    %181 = arith.addf %177, %180 : vector<16x16xf32>
    %c32 = arith.constant 32 : index
    %182 = memref.load %arg1[%c32] : memref<36xf32, #tpu.memory_space<smem>>
    %183 = vector.broadcast %182 : f32 to vector<16x16xf32>
    %184 = arith.mulf %183, %7 : vector<16x16xf32>
    %185 = arith.addf %181, %184 : vector<16x16xf32>
    %c33 = arith.constant 33 : index
    %186 = memref.load %arg1[%c33] : memref<36xf32, #tpu.memory_space<smem>>
    %187 = vector.broadcast %186 : f32 to vector<16x16xf32>
    %188 = arith.mulf %187, %8 : vector<16x16xf32>
    %189 = arith.addf %185, %188 : vector<16x16xf32>
    %c34 = arith.constant 34 : index
    %190 = memref.load %arg1[%c34] : memref<36xf32, #tpu.memory_space<smem>>
    %191 = vector.broadcast %190 : f32 to vector<16x16xf32>
    %192 = arith.mulf %191, %9 : vector<16x16xf32>
    %193 = arith.addf %189, %192 : vector<16x16xf32>
    %c35 = arith.constant 35 : index
    %194 = memref.load %arg1[%c35] : memref<36xf32, #tpu.memory_space<smem>>
    %195 = vector.broadcast %194 : f32 to vector<16x16xf32>
    %196 = arith.mulf %195, %10 : vector<16x16xf32>
    %197 = arith.addf %193, %196 : vector<16x16xf32>
    %c3_21 = arith.constant 3 : index
    %198 = memref.load %arg3[%c3_21] : memref<4xf32, #tpu.memory_space<smem>>
    %c3_22 = arith.constant 3 : index
    %199 = memref.load %arg2[%c3_22] : memref<4xf32, #tpu.memory_space<smem>>
    %200 = vector.broadcast %199 : f32 to vector<16x16xf32>
    %201 = arith.addf %197, %200 : vector<16x16xf32>
    %202 = vector.broadcast %198 : f32 to vector<16x16xf32>
    %203 = arith.mulf %202, %201 : vector<16x16xf32>
    %cst_23 = arith.constant 5.000000e-01 : f32
    %204 = vector.broadcast %cst_23 : f32 to vector<16x16xf32>
    %205 = arith.mulf %204, %203 : vector<16x16xf32>
    %206 = math.tanh %205 : vector<16x16xf32>
    %cst_24 = arith.constant 5.000000e-01 : f32
    %207 = vector.broadcast %cst_24 : f32 to vector<16x16xf32>
    %208 = arith.mulf %207, %206 : vector<16x16xf32>
    %cst_25 = arith.constant 5.000000e-01 : f32
    %209 = vector.broadcast %cst_25 : f32 to vector<16x16xf32>
    %210 = arith.addf %208, %209 : vector<16x16xf32>
    %211 = vector.shape_cast %60 : vector<16x16xf32> to vector<1x16x16xf32>
    %212 = vector.shape_cast %110 : vector<16x16xf32> to vector<1x16x16xf32>
    %213 = vector.shape_cast %160 : vector<16x16xf32> to vector<1x16x16xf32>
    %214 = vector.shape_cast %210 : vector<16x16xf32> to vector<1x16x16xf32>
    %215 = tpu.concatenate %211, %212, %213, %214 in 0 : vector<1x16x16xf32>, vector<1x16x16xf32>, vector<1x16x16xf32>, vector<1x16x16xf32> -> vector<4x16x16xf32>
    %216 = vector.shape_cast %215 : vector<4x16x16xf32> to vector<4x256xf32>
    %c0_26 = arith.constant 0 : index
    %c0_27 = arith.constant 0 : index
    %c0_28 = arith.constant 0 : index
    %217 = vector.load %arg5[%c0_26, %c0_27, %c0_28] : memref<1x4x256xf32, #tpu.memory_space<vmem>>, vector<1x4x256xf32>
    %218 = vector.shape_cast %217 : vector<1x4x256xf32> to vector<4x256xf32>
    %219 = vector.shape_cast %216 : vector<4x256xf32> to vector<1x4x256xf32>
    tpu.vector_store %arg5[%c0_26, %c0_27, %c0_28], %219 {strides = array<i32>} : memref<1x4x256xf32, #tpu.memory_space<vmem>>, vector<1x4x256xf32>,
    return
  }
  func.func @transform_0(%arg0: i32) -> i32 {
    %c0_i32 = arith.constant 0 : i32
    %c0_i32_0 = arith.constant 0 : i32
    return %c0_i32 : i32
  }
  func.func @transform_1(%arg0: i32) -> i32 {
    %c0_i32 = arith.constant 0 : i32
    %c0_i32_0 = arith.constant 0 : i32
    return %c0_i32 : i32
  }
  func.func @transform_2(%arg0: i32) -> i32 {
    %c0_i32 = arith.constant 0 : i32
    %c0_i32_0 = arith.constant 0 : i32
    return %c0_i32 : i32
  }
  func.func @transform_3(%arg0: i32) -> (i32, i32, i32) {
    %c0_i32 = arith.constant 0 : i32
    %c0_i32_0 = arith.constant 0 : i32
    %c0_i32_1 = arith.constant 0 : i32
    return %arg0, %c0_i32, %c0_i32_0 : i32, i32, i32
  }
  func.func @transform_4(%arg0: i32) -> (i32, i32, i32) {
    %c0_i32 = arith.constant 0 : i32
    %c0_i32_0 = arith.constant 0 : i32
    %c0_i32_1 = arith.constant 0 : i32
    return %arg0, %c0_i32, %c0_i32_0 : i32, i32, i32
  }
}

</mosaic_0001>

<bundles_post_ra>
// kernel: tpu_custom_call.1
= control target key start
LH: loop header
LB: loop body
LE: loop exit
PB: predicated region body
PF: predicated region fallthrough
CT: control target
= control target key end

     0   :  { %9 = vsyncpa [#allocation4], 0  ;;  %s2218_s0 = inlined_call_operand.vmem [shape: f32[36], index: 0, kind: input, shape index: {}]   ;;  %s2219_s1 = inlined_call_operand.vmem [shape: f32[4], index: 1, kind: input, shape index: {}]   ;;  %s2220_s2 = inlined_call_operand.vmem [shape: f32[4], index: 2, kind: input, shape index: {}]   ;;  %s2221_s3 = inlined_call_operand.vmem [shape: f32[2,18,18], index: 3, kind: input, shape index: {}]   ;;  %s2222_s4 = inlined_call_operand.hbm [shape: f32[2,4,256], index: 4, kind: output, shape index: {}]  }
   0x1   :  { %10 = vsyncpa [#allocation6], 0 }
   0x2   :  { %11 = vsyncpa [#allocation3], 0 }
   0x3   :  { %13 = vsyncpa [#allocation3 + $0x1], 0  ;;  %s1549_s15 = smov 0   ;;  %s1551_s16 = smov 0  }
   0x4   :  { %s1553_s17 = smov 0   ;;  %s1555_s18 = smov 0  }
   0x5 LB: > { %s1570_s19 = sadd.s32 4294967295, %s1506_s18   ;;  %s1235_s20 = sadd.s32 4294967294, %s1506_s18   ;;  %s1506_s18 = sphi %s1555_s18, %s2244_s18   ;;  %s1502_s17 = sphi %s1553_s17, %s2243_s17   ;;  %s1498_s16 = sphi %s1551_s16, %s2242_s16   ;;  %s1494_s15 = sphi %s1549_s15, %s2241_s15  }
   0x6   : > { %s1574_s21 = sadd.s32 1, %s1506_s18   ;;  %s115_s22 = sadd.s32 1, %s1502_s17 }
   0x7   : > { %s112_s23 = ssub.s32 %s1506_s18, %s1574_s21  ;;  %p125_p0 = scmp.ne.s32.totalorder %s1502_s17, %s1498_s16 }
   0x8   : > { %p113_p1 = scmp.eq.s32.totalorder %s112_s23, 0  ;;  %p126_p2 = scmp.eq.s32.totalorder %s1570_s19, 1 }
   0x9   : > { %p131_p3 = scmp.ne.s32.totalorder %s1498_s16, %s1494_s15  ;;  %p132_p4 = scmp.eq.s32.totalorder %s1235_s20, 1 }
   0xa   : > { %s1585_s24 = scalar_select %p113_p1, %s1502_s17, %s115_s22  }
   0xb   : > { %p1587_p5 = por %p126_p2, %p125_p0  ;;  %p1591_p6 = por %p132_p4, %p131_p3 }
   0xc   : > { %p1236_p7 = scmp.ge.s32.totalorder %s1506_s18, 1  ;;  %p139_p8 = scmp.lt.s32.totalorder %s1506_s18, 3 }
   0xd   : > { %s2228_s25 = scalar_select %p1587_p5, 1, 0 }
   0xe   : > { %s2229_s26 = scalar_select %p1591_p6, 1, 0 }
   0xf   : > { %p2223_p9 = scmp.eq.s32.totalorder %s1570_s19, 0  ;;  %p1598_p10 = pnand %p1236_p7, %p139_p8 }
  0x10   : > { %s163_s30 = sshll.u32 %s2219_s1, 4  ;;  %s152_s7 = sshll.u32 %s2218_s0, 4  ;;  %s164_s30 = int_to_ptr.vmem [resolvable:$true] %s163_s30  ;;  %s153_s7 = int_to_ptr.vmem [resolvable:$true] %s152_s7 }
  0x11   : > { %s2230_s27 = scalar_select %p1598_p10, 1, 0 }
  0x12   : > { %p1309_p11 = pneg %p1598_p10  ;;  %s174_s11 = sshll.u32 %s2220_s2, 4  ;;  %s1619_s11 = int_to_ptr.vmem [resolvable:$true] %s174_s11 }
  0x13   : > { %s1393_s12 = scalar_lea.vmem %s164_s30, 16  ;;  %p1401_p3 = scmp.lt.s32.totalorder %s164_s30, %s164_s30 }
  0x14   : > { %p1612_p12 = pnand %p2223_p9, %p1309_p11  ;;  %p1394_p13 = scmp.ne.s32.totalorder %s164_s30, %s1393_s12 }
  0x15   : > { %p1402_p4 = scmp.lt.s32.totalorder %s1393_s12, %s1393_s12 }
  0x16   : > { %p1395_p0 = pneg %p1612_p12 }
  0x17   : > { %p1403_p7 = por %p1402_p4, %p1401_p3 }
  0x18   : > { %p1396_p1 = pnand %p1395_p0, %p1394_p13 }
  0x1a   : > { %p1397_p2 = pneg %p1396_p1 }
  0x1c   : > { %p1404_p8 = pnand %p1403_p7, %p1397_p2 }
  0x1e   : > { %1407 = shalt.err (!%p1404_p8)
}
  0x1f   : > { %s1508_s13 = smov [#allocation5]   ;;  %s1408_s14 = scalar_lea.vmem %s153_s7, 16 }
  0x20   : > { %1315 = dma.vmem_to_smem (!%p1612_p12), %s164_s30, 16, %s1508_s13, [#allocation6]  }
  0x21   : > { %p1409_p11 = scmp.ne.s32.totalorder %s153_s7, %s1408_s14  ;;  %p1416_p5 = scmp.lt.s32.totalorder %s153_s7, %s153_s7 }
  0x22   : > { %p1417_p10 = scmp.lt.s32.totalorder %s1408_s14, %s1408_s14 }
  0x23   : > { %p1411_p9 = pnand %p1409_p11, %p1395_p0 }
  0x24   : > { %p1418_p13 = por %p1417_p10, %p1416_p5 }
  0x25   : > { %p1412_p6 = pneg %p1411_p9 }
  0x27   : > { %p1419_p1 = pnand %p1418_p13, %p1412_p6 }
  0x29   : > { %1422 = shalt.err (!%p1419_p1)
}
  0x2a   : > { %s1509_s20 = smov [#allocation2]   ;;  %s1423_s22 = scalar_lea.vmem %s1619_s11, 16 }
  0x2b   : > { %1312 = dma.vmem_to_smem (!%p1612_p12), %s153_s7, 16, %s1509_s20, [#allocation4]  }
  0x2c   : > { %p1424_p2 = scmp.ne.s32.totalorder %s1619_s11, %s1423_s22  ;;  %p1431_p9 = scmp.lt.s32.totalorder %s1619_s11, %s1619_s11 }
  0x2d   : > { %p1432_p7 = scmp.lt.s32.totalorder %s1423_s22, %s1423_s22 }
  0x2e   : > { %p1426_p3 = pnand %p1424_p2, %p1395_p0 }
  0x2f   : > { %p1433_p5 = por %p1432_p7, %p1431_p9 }
  0x30   : > { %p1427_p4 = pneg %p1426_p3 }
  0x32   : > { %p1434_p6 = pnand %p1433_p5, %p1427_p4 }
  0x34   : > { %1437 = shalt.err (!%p1434_p6)
}
  0x35   : > { %s1510_s23 = smov [#allocation7]   ;;  %p2232_p10 = scmp.ne.s32.totalorder %s2230_s27, 0 }
  0x36   : > { %1318 = dma.vmem_to_smem (!%p1612_p12), %s1619_s11, 16, %s1510_s23, [#allocation6]  }
  0x37   : > { %195 = sbr.rel (%p2232_p10) target bundleno = 474 (0x1da), region = 36  ;;  %p2233_p8 = scmp.eq.s32.totalorder (!%p2232_p10), %s1570_s19, 0 }
  0x3c   : > { %1481 = dma.done.wait (%p2233_p8), [#allocation4], 16   ;;  %p2234_p0 = pmov %p2233_p8 }
  0x3e   : > { %1483 = vsyncadd (%p2234_p0), [#allocation4], 4294967280  ;;  %p2235_p11 = pmov %p2234_p0 }
  0x3f   : > { %p2236_p13 = pmov %p2234_p0 }
  0x40   : > { %1485 = dma.done.wait (%p2235_p11), [#allocation6], 32  }
  0x41   : > { %1487 = vsyncadd (%p2236_p13), [#allocation6], 4294967264 }
  0x42   : > { %209 = sfence }
  0x43   : > { %p230_p1 = scmp.lt.s32.totalorder %s1570_s19, 1  ;;  %s1256_s28 = sld [smem:[#allocation2 + $0xa]]  ;;  %vm280_vm0 = vcmask 1046528   ;;  %vm340_vm1 = vcmask 1045504   ;;  %vm1104_vm2 = vcmask 130048   ;;  %vm1106_vm3 = vcmask 261120  }
  0x44   : > { %s1247_s27 = sld [smem:[#allocation2 + $0x1]]  ;;  %s1511_s10 = smov 127   ;;  %vm1108_vm4 = vcmask 392192   ;;  %vm1110_vm5 = vcmask 523264   ;;  %vm1112_vm6 = vcmask 654336   ;;  %vm1114_vm7 = vcmask 785408  }
  0x45   : > { %s231_s29 = scalar_select %p230_p1, %s1570_s19, 1  ;;  %vm1116_vm8 = vcmask 916480  }
  0x46   : > { %s1267_s5 = sld [smem:[#allocation2 + $0x13]]  ;;  %p2239_p2 = scmp.ne.s32.totalorder %s2228_s25, 0 }
  0x47   : > { %s1294_s30 = smul.u32 24, %s231_s29  ;;  %s1278_s9 = sld [smem:[#allocation2 + $0x1c]] }
  0x48   : > { %s1670_s11 = sld [smem:[#allocation2 + $0x2]] }
  0x49   : > { %s1658_s8 = scalar_lea.vmem %s2221_s3, %s1294_s30  ;;  %v415_v2 = vstv %s1256_s28  ;;  %s1250_s12 = sld [smem:[#allocation2 + $0x4]] }
  0x4a   : > { %v1661_v0 = vld [vmem:[%s1658_s8] sm:$0xff]  ;;  %v1664_v1 = vld [vmem:[%s1658_s8 + $0x8] sm:$0xff]  ;;  %v245_v4 = vstv %s1247_s27  ;;  %s1674_s13 = sld [smem:[#allocation2 + $0xb]]  ;;  %v1690_v14 = vld [vmem:[%s1658_s8 + $0x10] sm:$0x3] }
  0x4b   : > { %v416_v3 = vmul.f32 %v415_v2, %v1661_v0  ;;  %v417_v5 = vmul.f32 %v415_v2, %v1664_v1  ;;  %v246_v6 = vmul.f32 %v245_v4, %v1661_v0  ;;  %v247_v8 = vmul.f32 %v245_v4, %v1664_v1  ;;  %s1259_s14 = sld [smem:[#allocation2 + $0xd]] }
  0x4c   : > { %v583_v7 = vstv %s1267_s5  ;;  %s1678_s20 = sld [smem:[#allocation2 + $0x14]]  ;;  %s1512_s5 = smov 126  }
  0x4d   : > { %420 = vrot.lane.b32.xlu1 %v416_v3, %s1511_s10  ;;  %250 = vrot.lane.b32.xlu0 %v246_v6, %s1511_s10  ;;  %v585_v9 = vmul.f32 %v583_v7, %v1664_v1  ;;  %v751_v10 = vstv %s1278_s9  ;;  %v584_v11 = vmul.f32 %v583_v7, %v1661_v0  ;;  %s1682_s22 = sld [smem:[#allocation2 + $0x1d]] }
  0x4e   : > { %s1270_s23 = sld [smem:[#allocation2 + $0x16]]  ;;  %v753_v12 = vmul.f32 %v751_v10, %v1664_v1  ;;  %v259_v13 = vstv %s1670_s11  ;;  %v752_v16 = vmul.f32 %v751_v10, %v1661_v0 }
  0x4f   : > { %s1686_s28 = sld [smem:[#allocation2 + $0x1f]]  ;;  %v291_v15 = vstv %s1250_s12  ;;  %v261_v18 = vmul.f32 %v259_v13, %v1664_v1  ;;  %v260_v23 = vmul.f32 %v259_v13, %v1661_v0 }
  0x50   : > { %s1694_s29 = sld [smem:[#allocation2 + $0x5]]  ;;  %v429_v17 = vstv %s1674_s13  ;;  %v293_v19 = vmul.f32 %v291_v15, %v1664_v1  ;;  %v294_v20 = vmul.f32 %v291_v15, %v1690_v14  ;;  %v292_v22 = vmul.f32 %v291_v15, %v1661_v0 }
  0x51   : > { %422 = vrot.lane.b32.xlu1 %v417_v5, %s1511_s10  ;;  %252 = vrot.lane.b32.xlu0 %v247_v8, %s1511_s10  ;;  %v460_v21 = vstv %s1259_s14  ;;  %s1702_s27 = sld [smem:[#allocation2 + $0xe]]  ;;  %v431_v24 = vmul.f32 %v429_v17, %v1664_v1  ;;  %v430_v27 = vmul.f32 %v429_v17, %v1661_v0 }
  0x52   : > { %v597_v25 = vstv %s1678_s20  ;;  %v462_v28 = vmul.f32 %v460_v21, %v1664_v1  ;;  %v463_v29 = vmul.f32 %v460_v21, %v1690_v14  ;;  %s1712_s30 = sld [smem:[#allocation2 + $0x17]]  ;;  %v299_v31 = vrot.slane %v293_v19, 1 }
  0x53   : > { %v765_v26 = vstv %s1682_s22  ;;  %v301_v32 = vrot.slane %v294_v20, 1  ;;  %v461_v33 = vmul.f32 %v460_v21, %v1661_v0  ;;  %v599_v35 = vmul.f32 %v597_v25, %v1664_v1  ;;  %s1720_s6 = sld [smem:[#allocation2 + $0x19]] }
  0x54   : > { %v628_v30 = vstv %s1270_s23  ;;  %v598_v36 = vmul.f32 %v597_v25, %v1661_v0  ;;  %v767_v37 = vmul.f32 %v765_v26, %v1664_v1  ;;  %v298_v38 = vrot.slane %v292_v22, 1  ;;  %s1733_s7 = sld [smem:[#allocation2 + $0x20]] }
  0x55   : > { %590 = vrot.lane.b32.xlu1 %v585_v9, %s1511_s10  ;;  %588 = vrot.lane.b32.xlu0 %v584_v11, %s1511_s10  ;;  %v796_v34 = vstv %s1686_s28  ;;  %v630_v39 = vmul.f32 %v628_v30, %v1664_v1  ;;  %v631_v40 = vmul.f32 %v628_v30, %v1690_v14  ;;  %v629_v41 = vmul.f32 %v628_v30, %v1661_v0  ;;  %s1741_s8 = sld [smem:[#allocation2 + $0x22]] }
  0x56   : > { %v312_v42 = vstv %s1694_s29  ;;  %v766_v43 = vmul.f32 %v765_v26, %v1661_v0  ;;  %v798_v44 = vmul.f32 %v796_v34, %v1664_v1  ;;  %v799_v45 = vmul.f32 %v796_v34, %v1690_v14  ;;  %s1746_s9 = sld [smem:[#allocation2 + $0x8]] }
  0x57   : > { %v797_v46 = vmul.f32 %v796_v34, %v1661_v0  ;;  %v302_v47 = vsel %vm280_vm0, %v299_v31, %v301_v32  ;;  %v468_v48 = vrot.slane %v462_v28, 1  ;;  %v470_v49 = vrot.slane %v463_v29, 1  ;;  %s1759_s11 = sld [smem:[#allocation2 + $0x11]] }
  0x58   : > { %v467_v50 = vrot.slane %v461_v33, 1  ;;  %v1736_v51 = vsel %vm280_vm0, %v298_v38, %v299_v31  ;;  %v314_v52 = vmul.f32 %v312_v42, %v1664_v1  ;;  %v315_v53 = vmul.f32 %v312_v42, %v1690_v14  ;;  %s1764_s12 = sld [smem:[#allocation2 + $0x7]] }
  0x59   : > { %758 = vrot.lane.b32.xlu1 %v753_v12, %s1511_s10  ;;  %756 = vrot.lane.b32.xlu0 %v752_v16, %s1511_s10  ;;  %v481_v54 = vstv %s1702_s27  ;;  %v636_v55 = vrot.slane %v630_v39, 1  ;;  %v638_v56 = vrot.slane %v631_v40, 1  ;;  %v635_v57 = vrot.slane %v629_v41, 1  ;;  %s1779_s13 = sld [smem:[#allocation2 + $0x1a]] }
  0x5a   : > { %v313_v58 = vmul.f32 %v312_v42, %v1661_v0  ;;  %v804_v59 = vrot.slane %v798_v44, 1  ;;  %v806_v60 = vrot.slane %v799_v45, 1  ;;  %v803_v61 = vrot.slane %v797_v46, 1  ;;  %s1793_s14 = sld [smem:[#allocation2 + $0x10]] }
  0x5b   : > { %v649_v62 = vstv %s1712_s30  ;;  %v471_v63 = vsel %vm280_vm0, %v468_v48, %v470_v49  ;;  %v1751_v2 = vmul.f32 %v481_v54, %v1664_v1  ;;  %v1754_v3 = vmul.f32 %v481_v54, %v1690_v14  ;;  %s1819_s20 = sld [smem:[#allocation2 + $0x23]] }
  0x5c   : > { %v1757_v4 = vmul.f32 %v481_v54, %v1661_v0  ;;  %v1762_v5 = vsel %vm280_vm0, %v467_v50, %v468_v48  ;;  %v320_v6 = vrot.slane %v314_v52, 1  ;;  %v322_v7 = vrot.slane %v315_v53, 1  ;;  %s1868_s22 = sld [smem:[#allocation2 + $0x3]] }
  0x5d   : > { %266 = vrot.lane.b32.xlu1 %v261_v18, %s1512_s5  ;;  %264 = vrot.lane.b32.xlu0 %v260_v23, %s1512_s5  ;;  %v1767_v8 = vstv %s1720_s6  ;;  %v1771_v9 = vsel %vm280_vm0, %v636_v55, %v638_v56  ;;  %v319_v10 = vrot.slane %v313_v58, 1  ;;  %v1774_v11 = vmul.f32 %v649_v62, %v1664_v1  ;;  %s1873_s23 = sld [smem:[#allocation2 + $0xc]] }
  0x5e   : > { %v1777_v12 = vmul.f32 %v649_v62, %v1690_v14  ;;  %v1782_v13 = vsel %vm280_vm0, %v635_v57, %v636_v55  ;;  %v1785_v15 = vsel %vm280_vm0, %v804_v59, %v806_v60  ;;  %v1788_v16 = vsel %vm280_vm0, %v803_v61, %v804_v59  ;;  %s1882_s28 = sld [smem:[#allocation2 + $0x15]] }
  0x5f   : > { %v1791_v17 = vmul.f32 %v649_v62, %v1661_v0  ;;  %v489_v18 = vrot.slane %v1751_v2, 1  ;;  %v491_v19 = vrot.slane %v1754_v3, 1  ;;  %v488_v20 = vrot.slane %v1757_v4, 1  ;;  %s1935_s29 = sld [smem:[#allocation2 + $0x1e]] }
  0x60   : > { %v1801_v21 = vmul.f32 %v1767_v8, %v1664_v1  ;;  %v1804_v22 = vsel %vm280_vm0, %v320_v6, %v322_v7  ;;  %v817_v23 = vstv %s1733_s7  ;;  %v1810_v25 = vstv %s1741_s8  ;;  %s1951_s27 = sld [smem:[#allocation2 + $0x6]] }
  0x61   : > { %436 = vrot.lane.b32.xlu1 %v431_v24, %s1512_s5  ;;  %434 = vrot.lane.b32.xlu0 %v430_v27, %s1512_s5  ;;  %v688_v24 = vmul.f32 %v1767_v8, %v1661_v0  ;;  %v1814_v26 = vsel %vm280_vm0, %v319_v10, %v320_v6  ;;  %v657_v27 = vrot.slane %v1774_v11, 1  ;;  %v659_v28 = vrot.slane %v1777_v12, 1  ;;  %s1965_s30 = sld [smem:[#allocation2 + $0xf]] }
  0x62   : > { %v695_v29 = vrot.slane %v1801_v21, 2  ;;  %v656_v30 = vrot.slane %v1791_v17, 1  ;;  %v1824_v32 = vmul.f32 %v1810_v25, %v1664_v1  ;;  %v856_v33 = vmul.f32 %v1810_v25, %v1661_v0  ;;  %s1971_s6 = sld [smem:[#allocation2 + $0x18]] }
  0x63   : > { %v694_v31 = vrot.slane %v688_v24, 2  ;;  %v819_v34 = vmul.f32 %v817_v23, %v1664_v1  ;;  %v351_v38 = vstv %s1764_s12  ;;  %v1857_v45 = vstv %s1779_s13  ;;  %s2010_s7 = sld [smem:[#allocation2 + $0x21]] }
  0x64   : > { %v863_v40 = vrot.slane %v1824_v32, 2  ;;  %v862_v41 = vrot.slane %v856_v33, 2  ;;  %v818_v46 = vmul.f32 %v817_v23, %v1661_v0  ;;  %v1876_v55 = vmul.f32 %v351_v38, %v1664_v1  ;;  %s238_s8 = sld [smem:[#allocation2]] }
  0x65   : > { %604 = vrot.lane.b32.xlu1 %v599_v35, %s1512_s5  ;;  %602 = vrot.lane.b32.xlu0 %v598_v36, %s1512_s5  ;;  %v820_v35 = vmul.f32 %v817_v23, %v1690_v14  ;;  %v1832_v36 = vstv %s1746_s9  ;;  %v1841_v39 = vsel %vm340_vm1, %v694_v31, %v695_v29  ;;  %v825_v50 = vrot.slane %v819_v34, 1  ;;  %s1266_s9 = sld [smem:[#allocation2 + $0x12]] }
  0x66   : > { %v1848_v42 = vmul.f32 %v1832_v36, %v1664_v1  ;;  %v1864_v48 = vsel %vm340_vm1, %v862_v41, %v863_v40  ;;  %v1880_v57 = vmul.f32 %v1857_v45, %v1664_v1  ;;  %v354_v58 = vmul.f32 %v351_v38, %v1690_v14  ;;  %s392_s12 = sld [smem:[#allocation7]] }
  0x67   : > { %v827_v54 = vrot.slane %v820_v35, 1  ;;  %v709_v60 = vmul.f32 %v1857_v45, %v1661_v0  ;;  %v1895_v61 = vstv %s1819_s20  ;;  %v824_v62 = vrot.slane %v818_v46, 1  ;;  %s2166_s13 = sld [smem:[#allocation5 + $0x1]] }
  0x68   : > { %v2227_v4 = vrot.slane %v1880_v57, 2  ;;  %v1913_v7 = vmul.f32 %v1895_v61, %v1664_v1  ;;  %v877_v10 = vmul.f32 %v1895_v61, %v1661_v0  ;;  %v492_v12 = vsel %vm280_vm0, %v489_v18, %v491_v19  ;;  %s2170_s20 = sld [smem:[#allocation5 + $0x2]] }
  0x69   : > { %772 = vrot.lane.b32.xlu1 %v767_v37, %s1512_s5  ;;  %770 = vrot.lane.b32.xlu0 %v766_v43, %s1512_s5  ;;  %v1835_v37 = vstv %s1759_s11  ;;  %v373_v43 = vmul.f32 %v1832_v36, %v1661_v0  ;;  %v715_v6 = vrot.slane %v709_v60, 2  ;;  %v490_v17 = vsel %vm280_vm0, %v488_v20, %v489_v18  ;;  %s1277_s11 = sld [smem:[#allocation2 + $0x1b]] }
  0x6a   : > { %v1854_v44 = vmul.f32 %v1835_v37, %v1664_v1  ;;  %v541_v49 = vmul.f32 %v1835_v37, %v1661_v0  ;;  %v361_v24 = vrot.slane %v354_v58, 2  ;;  %v2226_v19 = vrot.slane %v1913_v7, 2 }
  0x6b   : > { %v379_v52 = vrot.slane %v373_v43, 2  ;;  %v1932_v31 = vsel %vm340_vm1, %v715_v6, %v2227_v4  ;;  %v883_v2 = vrot.slane %v877_v10, 2  ;;  %v660_v18 = vsel %vm280_vm0, %v657_v27, %v659_v28 }
  0x6c   : > { %v548_v53 = vrot.slane %v1854_v44, 2  ;;  %v547_v56 = vrot.slane %v541_v49, 2  ;;  %v1946_v20 = vsel %vm280_vm0, %v825_v50, %v827_v54  ;;  %v1949_v33 = vsel %vm280_vm0, %v824_v62, %v825_v50 }
  0x6d   : > { %305 = vrot.lane.b32.xlu1 %v302_v47, %s1511_s10  ;;  %303 = vrot.lane.b32.xlu0 %v1736_v51, %s1511_s10  ;;  %v519_v47 = vstv %s1793_s14  ;;  %v380_v51 = vrot.slane %v1848_v42, 2  ;;  %v273_v35 = vstv %s1868_s22  ;;  %v1982_v43 = vmul.f32 %v1767_v8, %v1690_v14  ;;  %s2168_s14 = sld [smem:[#allocation7 + $0x1]] }
  0x6e   : > { %v1903_v3 = vsel %vm340_vm1, %v547_v56, %v548_v53  ;;  %v1925_v23 = vmul.f32 %v519_v47, %v1690_v14  ;;  %v1958_v11 = vmul.f32 %v519_v47, %v1661_v0  ;;  %v611_v41 = vstv %s1882_s28  ;;  %s2172_s22 = sld [smem:[#allocation7 + $0x2]] }
  0x6f   : > { %v1890_v59 = vsel %vm340_vm1, %v379_v52, %v380_v51  ;;  %v275_v46 = vmul.f32 %v273_v35, %v1664_v1  ;;  %v274_v49 = vmul.f32 %v273_v35, %v1661_v0  ;;  %v613_v8 = vmul.f32 %v611_v41, %v1664_v1  ;;  %s2178_s28 = sld [smem:[#allocation7 + $0x3]] }
  0x70   : > { %v614_v58 = vmul.f32 %v611_v41, %v1690_v14  ;;  %v2238_v44 = vrot.slane %v1913_v7, 2 }
  0x71   : > { %474 = vrot.lane.b32.xlu1 %v471_v63, %s1511_s10  ;;  %472 = vrot.lane.b32.xlu0 %v1762_v5, %s1511_s10  ;;  %v1898_v63 = vmul.f32 %v351_v38, %v1661_v0  ;;  %v1909_v5 = vmul.f32 %v519_v47, %v1664_v1  ;;  %v443_v38 = vstv %s1873_s23  ;;  %v276_v47 = vmul.f32 %v273_v35, %v1690_v14  ;;  %s2175_s23 = sld [smem:[#allocation5 + $0x3]] }
  0x72   : > { %v445_v50 = vmul.f32 %v443_v38, %v1664_v1  ;;  %v446_v52 = vmul.f32 %v443_v38, %v1690_v14  ;;  %v282_v54 = vrot.slane %v275_v46, 1  ;;  %v281_v60 = vrot.slane %v274_v49, 1 }
  0x73   : > { %v358_v34 = vrot.slane %v1898_v63, 2  ;;  %v527_v28 = vrot.slane %v1909_v5, 2  ;;  %v284_v56 = vrot.slane %v276_v47, 1  ;;  %v612_v35 = vmul.f32 %v611_v41, %v1661_v0 }
  0x74   : > { %v451_v62 = vrot.slane %v445_v50, 1  ;;  %v453_v6 = vrot.slane %v446_v52, 1  ;;  %v697_v63 = vrot.slane %v1982_v43, 2 }
  0x75   : > { %642 = vrot.lane.b32.xlu1 %v1771_v9, %s1511_s10  ;;  %v359_v9 = vrot.slane %v1876_v55, 2  ;;  %640 = vrot.lane.b32.xlu0 %v1782_v13, %s1511_s10  ;;  %v1943_v13 = vsel %vm280_vm0, %v656_v30, %v657_v27  ;;  %v1963_v27 = vsel %vm340_vm1, %v883_v2, %v2226_v19  ;;  %v529_v30 = vrot.slane %v1925_v23, 2 }
  0x76   : > { %v621_v2 = vrot.slane %v614_v58, 1  ;;  %v2004_v46 = vsel %vm280_vm0, %v451_v62, %v453_v6  ;;  %v618_v50 = vrot.slane %v612_v35, 1 }
  0x77   : > { %v530_v55 = vsel %vm340_vm1, %v527_v28, %v529_v30 }
  0x79   : > { %810 = vrot.lane.b32.xlu1 %v1785_v15, %s1511_s10  ;;  %808 = vrot.lane.b32.xlu0 %v1788_v16, %s1511_s10  ;;  %v1978_v15 = vsel %vm340_vm1, %v359_v9, %v361_v24  ;;  %v444_v16 = vmul.f32 %v443_v38, %v1661_v0  ;;  %v1997_v24 = vsel %vm280_vm0, %v282_v54, %v284_v56  ;;  %v502_v56 = vstv %s1965_s30  ;;  %s1517_s30 = smov 96  }
  0x7a   : > { %v2001_v38 = vsel %vm280_vm0, %v281_v60, %v282_v54  ;;  %v333_v54 = vstv %s1951_s27  ;;  %v504_v35 = vmul.f32 %v502_v56, %v1664_v1  ;;  %s1516_s27 = smov 64  }
  0x7b   : > { %v450_v10 = vrot.slane %v444_v16, 1 }
  0x7c   : > { %v510_v19 = vrot.slane %v504_v35, 2 }
  0x7d   : > { %326 = vrot.lane.b32.xlu1 %v1804_v22, %s1512_s5  ;;  %324 = vrot.lane.b32.xlu0 %v1814_v26, %s1512_s5  ;;  %v619_v22 = vrot.slane %v613_v8, 1  ;;  %v2007_v47 = vsel %vm280_vm0, %v450_v10, %v451_v62  ;;  %v779_v26 = vstv %s1935_s29  ;;  %v670_v8 = vstv %s1971_s6  ;;  %s1515_s29 = smov 32   ;;  %s1519_s6 = smov 16  }
  0x7e   : > { %v781_v41 = vmul.f32 %v779_v26, %v1664_v1  ;;  %v782_v52 = vmul.f32 %v779_v26, %v1690_v14  ;;  %v780_v16 = vmul.f32 %v779_v26, %v1661_v0  ;;  %v335_v62 = vmul.f32 %v333_v54, %v1664_v1 }
  0x7f   : > { %v2014_v49 = vsel %vm280_vm0, %v619_v22, %v621_v2  ;;  %v2024_v58 = vsel %vm280_vm0, %v618_v50, %v619_v22  ;;  %v336_v10 = vmul.f32 %v333_v54, %v1690_v14  ;;  %v334_v2 = vmul.f32 %v333_v54, %v1661_v0 }
  0x80   : > { %v787_v60 = vrot.slane %v781_v41, 1  ;;  %v786_v6 = vrot.slane %v780_v16, 1  ;;  %v505_v22 = vmul.f32 %v502_v56, %v1690_v14  ;;  %v503_v50 = vmul.f32 %v502_v56, %v1661_v0 }
  0x81   : > { %495 = vrot.lane.b32.xlu1 %v492_v12, %s1512_s5  ;;  %493 = vrot.lane.b32.xlu0 %v490_v17, %s1512_s5  ;;  %v789_v12 = vrot.slane %v782_v52, 1  ;;  %v342_v17 = vrot.slane %v335_v62, 2  ;;  %v344_v52 = vrot.slane %v336_v10, 2  ;;  %v341_v16 = vrot.slane %v334_v2, 2 }
  0x82   : > { %v2037_v41 = vsel %vm280_vm0, %v786_v6, %v787_v60  ;;  %v512_v54 = vrot.slane %v505_v22, 2  ;;  %v673_v4 = vmul.f32 %v670_v8, %v1690_v14  ;;  %v838_v6 = vstv %s2010_s7  ;;  %s1520_s7 = smov 48  }
  0x83   : > { %v2032_v26 = vsel %vm280_vm0, %v787_v60, %v789_v12  ;;  %v672_v12 = vmul.f32 %v670_v8, %v1664_v1  ;;  %v2044_v62 = vsel %vm340_vm1, %v342_v17, %v344_v52  ;;  %v2047_v56 = vsel %vm340_vm1, %v341_v16, %v342_v17 }
  0x84   : > { %v671_v60 = vmul.f32 %v670_v8, %v1661_v0  ;;  %v680_v35 = vrot.slane %v673_v4, 2  ;;  %v841_v17 = vmul.f32 %v838_v6, %v1690_v14  ;;  %v839_v52 = vmul.f32 %v838_v6, %v1661_v0 }
  0x85   : > { %663 = vrot.lane.b32.xlu1 %v660_v18, %s1512_s5  ;;  %661 = vrot.lane.b32.xlu0 %v1943_v13, %s1512_s5  ;;  %v509_v18 = vrot.slane %v503_v50, 2  ;;  %v2054_v13 = vsel %vm340_vm1, %v510_v19, %v512_v54  ;;  %v678_v2 = vrot.slane %v672_v12, 2  ;;  %v840_v50 = vmul.f32 %v838_v6, %v1664_v1 }
  0x86   : > { %v677_v22 = vrot.slane %v671_v60, 2  ;;  %v848_v54 = vrot.slane %v841_v17, 2 }
  0x87   : > { %v2057_v10 = vsel %vm340_vm1, %v509_v18, %v510_v19  ;;  %v526_v19 = vrot.slane %v1958_v11, 2  ;;  %v2071_v4 = vsel %vm340_vm1, %v678_v2, %v680_v35  ;;  %v846_v16 = vrot.slane %v840_v50, 2 }
  0x88   : > { %v2074_v8 = vsel %vm340_vm1, %v677_v22, %v678_v2  ;;  %v845_v18 = vrot.slane %v839_v52, 2  ;;  %v698_v11 = vsel %vm340_vm1, %v695_v29, %v697_v63  ;;  %v745_v35 = vstv %s1277_s11 }
  0x89   : > { %831 = vrot.lane.b32.xlu1 %v1946_v20, %s1512_s5  ;;  %829 = vrot.lane.b32.xlu0 %v1949_v33, %s1512_s5  ;;  %v360_v20 = vsel %vm340_vm1, %v358_v34, %v359_v9  ;;  %v858_v9 = vmul.f32 %v1810_v25, %v1690_v14  ;;  %v2087_v33 = vsel %vm340_vm1, %v846_v16, %v848_v54 }
  0x8a   : > { %v2090_v34 = vsel %vm340_vm1, %v845_v18, %v846_v16  ;;  %v528_v23 = vsel %vm340_vm1, %v526_v19, %v527_v28  ;;  %v375_v25 = vmul.f32 %v1832_v36, %v1690_v14  ;;  %v543_v28 = vmul.f32 %v1835_v37, %v1690_v14 }
  0x8b   : > { %v865_v30 = vrot.slane %v858_v9, 2  ;;  %v711_v36 = vmul.f32 %v1857_v45, %v1690_v14  ;;  %v746_v54 = vmul.f32 %v745_v35, %v1661_v0 }
  0x8c   : > { %v550_v29 = vrot.slane %v543_v28, 2 }
  0x8d   : > { %365 = vrot.lane.b32.xlu1 %v1978_v15, %s1511_s10  ;;  %363 = vrot.lane.b32.xlu0 %v360_v20, %s1511_s10  ;;  %v866_v5 = vsel %vm340_vm1, %v863_v40, %v865_v30  ;;  %v382_v15 = vrot.slane %v375_v25, 2  ;;  %v718_v37 = vrot.slane %v711_v36, 2  ;;  %v2237_v40 = vrot.slane %v1880_v57, 2 }
  0x8e   : > { %v551_v32 = vsel %vm340_vm1, %v548_v53, %v550_v29  ;;  %v747_v20 = vmul.f32 %v745_v35, %v1664_v1 }
  0x8f   : > { %v383_v21 = vsel %vm340_vm1, %v380_v51, %v382_v15  ;;  %v719_v42 = vsel %vm340_vm1, %v2237_v40, %v718_v37  ;;  %v239_v51 = vstv %s238_s8  ;;  %s1522_s8 = smov 112  }
  0x90   : > { %v240_v57 = vmul.f32 %v239_v51, %v1661_v0  ;;  %v241_v12 = vmul.f32 %v239_v51, %v1664_v1 }
  0x91   : > { %533 = vrot.lane.b32.xlu1 %v530_v55, %s1511_s10  ;;  %531 = vrot.lane.b32.xlu0 %v528_v23, %s1511_s10 }
  0x95   : > { %701 = vrot.lane.b32.xlu1 %v698_v11, %s1511_s10  ;;  %699 = vrot.lane.b32.xlu0 %v1841_v39, %s1511_s10  ;;  %v879_v39 = vmul.f32 %v1895_v61, %v1690_v14 }
  0x97   : > { %v886_v45 = vrot.slane %v879_v39, 2 }
  0x99   : > { %869 = vrot.lane.b32.xlu1 %v866_v5, %s1511_s10  ;;  %867 = vrot.lane.b32.xlu0 %v1864_v48, %s1511_s10  ;;  %v887_v48 = vsel %vm340_vm1, %v2238_v44, %v886_v45  ;;  %s1255_s10 = sld [smem:[#allocation2 + $0x9]] }
  0x9d   : > { %386 = vrot.lane.b32.xlu1 %v383_v21, %s1512_s5  ;;  %384 = vrot.lane.b32.xlu0 %v1890_v59, %s1512_s5 }
  0x9f   : > { %v409_v14 = vstv %s1255_s10  ;;  %s1521_s10 = smov 80  }
  0xa0   : > { %v410_v53 = vmul.f32 %v409_v14, %v1661_v0 }
  0xa1   : > { %554 = vrot.lane.b32.xlu1 %v551_v32, %s1512_s5  ;;  %552 = vrot.lane.b32.xlu0 %v1903_v3, %s1512_s5  ;;  %v411_v3 = vmul.f32 %v409_v14, %v1664_v1 }
  0xa5   : > { %722 = vrot.lane.b32.xlu1 %v719_v42, %s1512_s5  ;;  %720 = vrot.lane.b32.xlu0 %v1932_v31, %s1512_s5  ;;  %v577_v31 = vstv %s1266_s9  ;;  %s227_s9 = sand.u32 1, %s1498_s16  }
  0xa6   : > { %v579_v6 = vmul.f32 %v577_v31, %v1664_v1  ;;  %v578_v50 = vmul.f32 %v577_v31, %v1661_v0  ;;  %s1245_s11 = sshll.u32 %s227_s9, 3 }
  0xa9   : > { %890 = vrot.lane.b32.xlu1 %v887_v48, %s1512_s5  ;;  %888 = vrot.lane.b32.xlu0 %v1963_v27, %s1512_s5  ;;  %s393_s5 = sld [smem:[#allocation5]] }
  0xbf   : > { %v421_v59 = vpop.permute.xlu1 %420  ;;  %v251_v7 = vpop.permute.xlu0 %250 }
  0xc0   : > { %v426_v61 = vadd.f32 %v421_v59, %v410_v53  ;;  %v256_v43 = vadd.f32 %v251_v7, %v240_v57 }
  0xc3   : > { %v423_v27 = vpop.permute.xlu1 %422  ;;  %v253_v2 = vpop.permute.xlu0 %252 }
  0xc4   : > { %v427_v60 = vadd.f32 %v423_v27, %v411_v3  ;;  %v257_v22 = vadd.f32 %v253_v2, %v241_v12 }
  0xc7   : > { %v591_v17 = vpop.permute.xlu1 %590  ;;  %v589_v19 = vpop.permute.xlu0 %588 }
  0xc8   : > { %v595_v52 = vadd.f32 %v591_v17, %v579_v6  ;;  %v594_v16 = vadd.f32 %v589_v19, %v578_v50 }
  0xcb   : > { %v759_v18 = vpop.permute.xlu1 %758  ;;  %v757_v63 = vpop.permute.xlu0 %756 }
  0xcc   : > { %v763_v55 = vadd.f32 %v759_v18, %v747_v20  ;;  %v762_v9 = vadd.f32 %v757_v63, %v746_v54 }
  0xcf   : > { %v267_v23 = vpop.permute.xlu1 %266  ;;  %v265_v30 = vpop.permute.xlu0 %264 }
  0xd0   : > { %v271_v11 = vadd.f32 %v267_v23, %v257_v22  ;;  %v270_v25 = vadd.f32 %v265_v30, %v256_v43 }
  0xd2   : > { %v289_v5 = vadd.f32 %v1997_v24, %v271_v11  ;;  %v288_v21 = vadd.f32 %v2001_v38, %v270_v25 }
  0xd3   : > { %v437_v15 = vpop.permute.xlu1 %436  ;;  %v435_v29 = vpop.permute.xlu0 %434 }
  0xd4   : > { %v441_v28 = vadd.f32 %v437_v15, %v427_v60  ;;  %v440_v1 = vadd.f32 %v435_v29, %v426_v61 }
  0xd6   : > { %v458_v36 = vadd.f32 %v2004_v46, %v441_v28  ;;  %v457_v37 = vadd.f32 %v2007_v47, %v440_v1 }
  0xd7   : > { %v605_v32 = vpop.permute.xlu1 %604  ;;  %v603_v39 = vpop.permute.xlu0 %602 }
  0xd8   : > { %v609_v0 = vadd.f32 %v605_v32, %v595_v52  ;;  %v608_v40 = vadd.f32 %v603_v39, %v594_v16  ;;  %v394_v32 = vstv %s393_s5  ;;  %s1293_s5 = sshll.u32 %s1570_s19, 7 }
  0xda   : > { %v626_v42 = vadd.f32 %v2014_v49, %v609_v0  ;;  %v625_v24 = vadd.f32 %v2024_v58, %v608_v40  ;;  %v397_v40 = vstv %s392_s12  ;;  %s229_s12 = scalar_lea.vmem [#allocation8], %s1245_s11 }
  0xdb   : > { %v773_v45 = vpop.permute.xlu1 %772  ;;  %v771_v48 = vpop.permute.xlu0 %770 }
  0xdc   : > { %v777_v44 = vadd.f32 %v773_v45, %v763_v55  ;;  %v776_v14 = vadd.f32 %v771_v48, %v762_v9 }
  0xde   : > { %v794_v38 = vadd.f32 %v2032_v26, %v777_v44  ;;  %v793_v53 = vadd.f32 %v2037_v41, %v776_v14  ;;  %v562_v44 = vstv %s2166_s13  ;;  %s1145_s13 = sshll.u32 %s229_s12, 4  ;;  %s1146_s13 = int_to_ptr.vmem [resolvable:$true] %s1145_s13 }
  0xdf   : > { %v306_v51 = vpop.permute.xlu1 %305  ;;  %v304_v46 = vpop.permute.xlu0 %303 }
  0xe0   : > { %v310_v31 = vadd.f32 %v306_v51, %v289_v5  ;;  %v309_v43 = vadd.f32 %v304_v46, %v288_v21 }
  0xe3   : > { %v475_v57 = vpop.permute.xlu1 %474  ;;  %v473_v59 = vpop.permute.xlu0 %472 }
  0xe4   : > { %v479_v58 = vadd.f32 %v475_v57, %v458_v36  ;;  %v478_v2 = vadd.f32 %v473_v59, %v457_v37 }
  0xe7   : > { %v643_v61 = vpop.permute.xlu1 %642  ;;  %v641_v47 = vpop.permute.xlu0 %640 }
  0xe8   : > { %v647_v50 = vadd.f32 %v643_v61, %v626_v42  ;;  %v646_v19 = vadd.f32 %v641_v47, %v625_v24 }
  0xeb   : > { %v811_v3 = vpop.permute.xlu1 %810  ;;  %v809_v7 = vpop.permute.xlu0 %808 }
  0xec   : > { %v815_v55 = vadd.f32 %v811_v3, %v794_v38  ;;  %v814_v23 = vadd.f32 %v809_v7, %v793_v53  ;;  %v565_v53 = vstv %s2168_s14 }
  0xef   : > { %v327_v49 = vpop.permute.xlu1 %326  ;;  %v325_v27 = vpop.permute.xlu0 %324 }
  0xf0   : > { %v331_v12 = vadd.f32 %v327_v49, %v310_v31  ;;  %v330_v60 = vadd.f32 %v325_v27, %v309_v43  ;;  %v730_v43 = vstv %s2170_s20  ;;  %v733_v27 = vstv %s2172_s22  ;;  %s1143_s22 = scalar_lea.hbm %s2222_s4, %s1293_s5 }
  0xf2   : > { %v349_v6 = vadd.f32 %v2044_v62, %v331_v12  ;;  %v348_v41 = vadd.f32 %v2047_v56, %v330_v60 }
  0xf3   : > { %v496_v26 = vpop.permute.xlu1 %495  ;;  %v494_v22 = vpop.permute.xlu0 %493 }
  0xf4   : > { %v500_v35 = vadd.f32 %v496_v26, %v479_v58  ;;  %v499_v17 = vadd.f32 %v494_v22, %v478_v2 }
  0xf6   : > { %v517_v52 = vadd.f32 %v2054_v13, %v500_v35  ;;  %v516_v54 = vadd.f32 %v2057_v10, %v499_v17 }
  0xf7   : > { %v664_v20 = vpop.permute.xlu1 %663  ;;  %v662_v18 = vpop.permute.xlu0 %661 }
  0xf8   : > { %v668_v16 = vadd.f32 %v664_v20, %v647_v50  ;;  %v667_v63 = vadd.f32 %v662_v18, %v646_v19  ;;  %v898_v50 = vstv %s2175_s23  ;;  %v901_v18 = vstv %s2178_s28  ;;  %s1131_s23 = scalar_lea.sflag [#allocation3], %s227_s9  ;;  %s1438_s28 = scalar_lea.vmem %s1146_s13, 128 }
  0xf9   : > { %p1439_p12 = scmp.ne.s32.totalorder %s1146_s13, %s1438_s28 }
  0xfa   : > { %v685_v62 = vadd.f32 %v2071_v4, %v668_v16  ;;  %v684_v56 = vadd.f32 %v2074_v8, %v667_v63 }
  0xfb   : > { %v832_v9 = vpop.permute.xlu1 %831  ;;  %v830_v30 = vpop.permute.xlu0 %829  ;;  %p1440_p3 = pnand %p1439_p12, %p2239_p2 }
  0xfc   : > { %v836_v11 = vadd.f32 %v832_v9, %v815_v55  ;;  %v835_v25 = vadd.f32 %v830_v30, %v814_v23 }
  0xfd   : > { %p1441_p4 = pneg %p1440_p3 }
  0xfe   : > { %v853_v5 = vadd.f32 %v2087_v33, %v836_v11  ;;  %v852_v15 = vadd.f32 %v2090_v34, %v835_v25 }
  0xff   : > { %v366_v13 = vpop.permute.xlu1 %365  ;;  %v364_v28 = vpop.permute.xlu0 %363 }
 0x100   : > { %v370_v8 = vadd.f32 %v366_v13, %v349_v6  ;;  %v369_v0 = vadd.f32 %v364_v28, %v348_v41 }
 0x103   : > { %v534_v21 = vpop.permute.xlu1 %533  ;;  %v532_v10 = vpop.permute.xlu0 %531 }
 0x104   : > { %v538_v39 = vadd.f32 %v534_v21, %v517_v52  ;;  %v537_v48 = vadd.f32 %v532_v10, %v516_v54  ;;  %v917_v21 = vlaneseq }
 0x107   : > { %v702_v29 = vpop.permute.xlu1 %701  ;;  %v700_v1 = vpop.permute.xlu0 %699 }
 0x108   : > { %v706_v47 = vadd.f32 %v702_v29, %v685_v62  ;;  %v705_v7 = vadd.f32 %v700_v1, %v684_v56 }
 0x10b   : > { %v870_v4 = vpop.permute.xlu1 %869  ;;  %v868_v36 = vpop.permute.xlu0 %867 }
 0x10c   : > { %v874_v6 = vadd.f32 %v870_v4, %v853_v5  ;;  %v873_v52 = vadd.f32 %v868_v36, %v852_v15  ;;  %v1513_v15 = vmov 1983009808  }
 0x10d   : > { %v915_v28 = vunpack.c.l.s4 %v1513_v15 }
 0x10f   : > { %v387_v33 = vpop.permute.xlu1 %386  ;;  %v385_v37 = vpop.permute.xlu0 %384 }
 0x110   : > { %v391_v34 = vadd.f32 %v387_v33, %v370_v8  ;;  %v390_v45 = vadd.f32 %v385_v37, %v369_v0  ;;  %v916_v8 = vunpack.c.0.s8 %v915_v28 }
 0x112   : > { %v396_v42 = vadd.f32 %v394_v32, %v391_v34  ;;  %v395_v14 = vadd.f32 %v394_v32, %v390_v45  ;;  %v918_v32 = vshrl.u32 %v917_v21, 7  ;;  %v1518_v21 = vmov 0.0  }
 0x113   : > { %v555_v24 = vpop.permute.xlu1 %554  ;;  %v553_v46 = vpop.permute.xlu0 %552 }
 0x114   : > { %v559_v38 = vadd.f32 %v555_v24, %v538_v39  ;;  %v399_v51 = vmul.f32 %v397_v40, %v396_v42  ;;  %v398_v57 = vmul.f32 %v397_v40, %v395_v14  ;;  %v558_v61 = vadd.f32 %v553_v46, %v537_v48 }
 0x115   : > { %v1514_v40 = vmov 1934713408   ;;  %v919_v14 = vsub.s32 %v916_v8, %v918_v32 }
 0x116   : > { %v564_v59 = vadd.f32 %v562_v44, %v559_v38  ;;  %v563_v49 = vadd.f32 %v562_v44, %v558_v61  ;;  %v401_v12 = vmul.f32 0.5, %v399_v51  ;;  %v400_v26 = vmul.f32 0.5, %v398_v57 }
 0x117   : > { %v723_v3 = vpop.permute.xlu1 %722  ;;  %v721_v60 = vpop.permute.xlu0 %720  ;;  %v947_v42 = vunpack.c.l.s4 %v1514_v40 }
 0x118   : > { %v567_v31 = vmul.f32 %v565_v53, %v564_v59  ;;  %v727_v58 = vadd.f32 %v723_v3, %v706_v47  ;;  %v566_v2 = vmul.f32 %v565_v53, %v563_v49  ;;  %v726_v35 = vadd.f32 %v721_v60, %v705_v7 }
 0x119   : > { %1377 = vtanh.f32 %v401_v12  ;;  %v948_v61 = vunpack.c.0.s8 %v947_v42 }
 0x11a   : > { %v569_v41 = vmul.f32 0.5, %v567_v31  ;;  %v732_v22 = vadd.f32 %v730_v43, %v727_v58  ;;  %v568_v20 = vmul.f32 0.5, %v566_v2  ;;  %v731_v19 = vadd.f32 %v730_v43, %v726_v35 }
 0x11b   : > { %v891_v17 = vpop.permute.xlu1 %890  ;;  %v889_v55 = vpop.permute.xlu0 %888  ;;  %1379 = vtanh.f32 %v400_v26 }
 0x11c   : > { %v895_v16 = vadd.f32 %v891_v17, %v874_v6  ;;  %v735_v54 = vmul.f32 %v733_v27, %v732_v22  ;;  %v734_v63 = vmul.f32 %v733_v27, %v731_v19  ;;  %v894_v9 = vadd.f32 %v889_v55, %v873_v52 }
 0x11d   : > { %1381 = vtanh.f32 %v569_v41  ;;  %v951_v6 = vsub.s32 %v948_v61, %v918_v32 }
 0x11e   : > { %v900_v62 = vadd.f32 %v898_v50, %v895_v16  ;;  %v737_v23 = vmul.f32 0.5, %v735_v54  ;;  %1383 = vtanh.f32 %v568_v20  ;;  %v736_v11 = vmul.f32 0.5, %v734_v63 }
 0x11f   : > { %v899_v30 = vadd.f32 %v898_v50, %v894_v9 }
 0x120   : > { %v903_v56 = vmul.f32 %v901_v18, %v900_v62  ;;  %1385 = vtanh.f32 %v737_v23 }
 0x121   : > { %1387 = vtanh.f32 %v736_v11  ;;  %v902_v5 = vmul.f32 %v901_v18, %v899_v30 }
 0x122   : > { %v905_v25 = vmul.f32 0.5, %v903_v56 }
 0x123   : > { %v904_v13 = vmul.f32 0.5, %v902_v5 }
 0x124   : > { %1389 = vtanh.f32 %v905_v25 }
 0x125   : > { %1391 = vtanh.f32 %v904_v13 }
 0x126   : > { %v1378_v10 = vpop.eup %1377 }
 0x127   : > { %v405_v36 = vmul.f32 0.5, %v1378_v10 }
 0x128   : > { %v1380_v29 = vpop.eup %1379 }
 0x129   : > { %v404_v0 = vmul.f32 0.5, %v1380_v29  ;;  %v407_v24 = vadd.f32 0.5, %v405_v36 }
 0x12a   : > { %v1382_v1 = vpop.eup %1381 }
 0x12b   : > { %v1384_v4 = vpop.eup %1383  ;;  %v573_v37 = vmul.f32 0.5, %v1382_v1  ;;  %v406_v38 = vadd.f32 0.5, %v404_v0 }
 0x12c   : > { %v572_v51 = vmul.f32 0.5, %v1384_v4 }
 0x12d   : > { %v1386_v33 = vpop.eup %1385  ;;  %v575_v59 = vadd.f32 0.5, %v573_v37 }
 0x12e   : > { %v1388_v34 = vpop.eup %1387  ;;  %v741_v39 = vmul.f32 0.5, %v1386_v33  ;;  %v574_v12 = vadd.f32 0.5, %v572_v51 }
 0x12f   : > { %v740_v45 = vmul.f32 0.5, %v1388_v34 }
 0x130   : > { %v743_v48 = vadd.f32 0.5, %v741_v39 }
 0x131   : > { %v1390_v44 = vpop.eup %1389  ;;  %v742_v53 = vadd.f32 0.5, %v740_v45 }
 0x132   : > { %v909_v46 = vmul.f32 0.5, %v1390_v44  ;;  %v1392_v57 = vpop.eup %1391  ;;  %v980_v47 = vcombine.low %v407_v24, %v743_v48  ;;  %v981_v3 = vcombine.high %v407_v24, %v743_v48 }
 0x133   : > { %v908_v31 = vmul.f32 0.5, %v1392_v57  ;;  %v912_v49 = vcombine.low %v406_v38, %v742_v53  ;;  %v913_v43 = vcombine.high %v406_v38, %v742_v53 }
 0x134   : > { %v911_v7 = vadd.f32 0.5, %v909_v46  ;;  %v988_v26 = vrot.slane %v980_v47, %v919_v14  ;;  %v995_v2 = vrot.slane %v981_v3, %v919_v14 }
 0x135   : > { %v910_v27 = vadd.f32 0.5, %v908_v31  ;;  %v920_v17 = vrot.slane %v912_v49, %v919_v14  ;;  %v927_v52 = vrot.slane %v913_v43, %v919_v14 }
 0x136   : > { %v996_v58 = vcombine.low %v575_v59, %v911_v7  ;;  %v997_v60 = vcombine.high %v575_v59, %v911_v7 }
 0x137   : > { %v928_v41 = vcombine.low %v574_v12, %v910_v27  ;;  %v929_v50 = vcombine.high %v574_v12, %v910_v27 }
 0x138   : > { %v1004_v35 = vrot.slane %v996_v58, %v919_v14  ;;  %v1011_v22 = vrot.slane %v997_v60, %v919_v14 }
 0x139   : > { %v936_v19 = vrot.slane %v928_v41, %v919_v14  ;;  %v943_v54 = vrot.slane %v929_v50, %v919_v14 }
 0x13a   : > { %v1013_v20 = vcombine.high %v988_v26, %v1004_v35  ;;  %v1028_v16 = vcombine.low %v995_v2, %v1011_v22  ;;  %v1029_v18 = vcombine.high %v995_v2, %v1011_v22  ;;  %v1012_v55 = vcombine.low %v988_v26, %v1004_v35 }
 0x13b   : > { %v945_v62 = vcombine.high %v920_v17, %v936_v19  ;;  %v960_v9 = vcombine.low %v927_v52, %v943_v54  ;;  %v961_v23 = vcombine.high %v927_v52, %v943_v54  ;;  %v944_v11 = vcombine.low %v920_v17, %v936_v19 }
 0x13c   : > { %v1027_v63 = vrot.slane %v1013_v20, %v951_v6  ;;  %v1036_v30 = vrot.slane %v1028_v16, %v951_v6  ;;  %v1043_v5 = vrot.slane %v1029_v18, %v951_v6  ;;  %v1020_v13 = vrot.slane %v1012_v55, %v951_v6 }
 0x13d   : > { %v959_v56 = vrot.slane %v945_v62, %v951_v6  ;;  %v968_v25 = vrot.slane %v960_v9, %v951_v6  ;;  %v975_v15 = vrot.slane %v961_v23, %v951_v6  ;;  %v952_v28 = vrot.slane %v944_v11, %v951_v6 }
 0x13e   : > { %1081 = vrot.lane.b32.xlu1 %v1027_v63, %s1515_s29  ;;  %v1044_v10 = vcombine.high %v1020_v13, %v1518_v21  ;;  %v1045_v1 = vcombine.high %v1027_v63, %v1518_v21  ;;  %v1046_v36 = vcombine.high %v1036_v30, %v1518_v21  ;;  %v1047_v32 = vcombine.high %v1043_v5, %v1518_v21 }
 0x13f   : > { %1053 = vrot.lane.b32.xlu0 %v959_v56, %s1515_s29  ;;  %v976_v29 = vcombine.high %v952_v28, %v1518_v21  ;;  %v977_v4 = vcombine.high %v959_v56, %v1518_v21  ;;  %v978_v8 = vcombine.high %v968_v25, %v1518_v21  ;;  %v979_v33 = vcombine.high %v975_v15, %v1518_v21  ;;  %s1523_s29 = smov [#allocation8]  }
 0x140   : > { %s1442_s19 = sshll.u32 %s1523_s29, 4  ;;  %s1443_s19 = int_to_ptr.vmem [resolvable:$false] %s1442_s19 }
 0x141   : > { %p1445_p9 = scmp.lt.s32.totalorder %s1146_s13, %s1443_s19 }
 0x142   : > { %1089 = vrot.lane.b32.xlu1 %v1036_v30, %s1516_s27 }
 0x143   : > { %1061 = vrot.lane.b32.xlu0 %v968_v25, %s1516_s27  ;;  %s1444_s27 = scalar_lea.vmem %s1443_s19, 256 }
 0x144   : > { %p1446_p7 = scmp.lt.s32.totalorder %s1444_s27, %s1438_s28 }
 0x146   : > { %1097 = vrot.lane.b32.xlu1 %v1043_v5, %s1517_s30  ;;  %p1447_p5 = por %p1446_p7, %p1445_p9 }
 0x147   : > { %1069 = vrot.lane.b32.xlu0 %v975_v15, %s1517_s30 }
 0x148   : > { %p1448_p6 = pnand %p1447_p5, %p1441_p4 }
 0x14a   : > { %1077 = vrot.lane.b32.xlu1 %v1044_v10, %s1519_s6 }
 0x14b   : > { %1049 = vrot.lane.b32.xlu0 %v976_v29, %s1519_s6 }
 0x14e   : > { %1085 = vrot.lane.b32.xlu1 %v1045_v1, %s1520_s7 }
 0x14f   : > { %1057 = vrot.lane.b32.xlu0 %v977_v4, %s1520_s7 }
 0x152   : > { %1093 = vrot.lane.b32.xlu1 %v1046_v36, %s1521_s10 }
 0x153   : > { %1065 = vrot.lane.b32.xlu0 %v978_v8, %s1521_s10 }
 0x156   : > { %1101 = vrot.lane.b32.xlu1 %v1047_v32, %s1522_s8 }
 0x157   : > { %1073 = vrot.lane.b32.xlu0 %v979_v33, %s1522_s8 }
 0x1b0   : > { %v1082_v0 = vpop.permute.xlu1 %1081 }
 0x1b1   : > { %v1054_v34 = vpop.permute.xlu0 %1053 }
 0x1b4   : > { %v1090_v37 = vpop.permute.xlu1 %1089 }
 0x1b5   : > { %v1062_v39 = vpop.permute.xlu0 %1061 }
 0x1b8   : > { %v1098_v40 = vpop.permute.xlu1 %1097 }
 0x1b9   : > { %v1070_v42 = vpop.permute.xlu0 %1069 }
 0x1bc   : > { %v1078_v45 = vpop.permute.xlu1 %1077 }
 0x1bd   : > { %v1118_v44 = vsel %vm1104_vm2, %v1020_v13, %v1078_v45  ;;  %v1050_v24 = vpop.permute.xlu0 %1049 }
 0x1be   : > { %v1105_v48 = vsel %vm1104_vm2, %v952_v28, %v1050_v24  ;;  %v1119_v14 = vsel %vm1106_vm3, %v1118_v44, %v1082_v0 }
 0x1bf   : > { %v1107_v53 = vsel %vm1106_vm3, %v1105_v48, %v1054_v34 }
 0x1c0   : > { %v1086_v38 = vpop.permute.xlu1 %1085 }
 0x1c1   : > { %v1120_v51 = vsel %vm1108_vm4, %v1119_v14, %v1086_v38  ;;  %v1058_v46 = vpop.permute.xlu0 %1057 }
 0x1c2   : > { %v1109_v57 = vsel %vm1108_vm4, %v1107_v53, %v1058_v46  ;;  %v1121_v59 = vsel %vm1110_vm5, %v1120_v51, %v1090_v37 }
 0x1c3   : > { %v1111_v3 = vsel %vm1110_vm5, %v1109_v57, %v1062_v39 }
 0x1c4   : > { %v1094_v61 = vpop.permute.xlu1 %1093 }
 0x1c5   : > { %v1122_v47 = vsel %vm1112_vm6, %v1121_v59, %v1094_v61  ;;  %v1066_v7 = vpop.permute.xlu0 %1065 }
 0x1c6   : > { %v1113_v31 = vsel %vm1112_vm6, %v1111_v3, %v1066_v7  ;;  %v1123_v49 = vsel %vm1114_vm7, %v1122_v47, %v1098_v40 }
 0x1c7   : > { %v1115_v27 = vsel %vm1114_vm7, %v1113_v31, %v1070_v42 }
 0x1c8   : > { %v1102_v43 = vpop.permute.xlu1 %1101 }
 0x1c9   : > { %v1124_v12 = vsel %vm1116_vm8, %v1123_v49, %v1102_v43  ;;  %v1074_v58 = vpop.permute.xlu0 %1073 }
 0x1ca   : > { %v1117_v60 = vsel %vm1116_vm8, %v1115_v27, %v1074_v58 }
 0x1cb   : > { %v1127_v6 = vcombine.low %v1117_v60, %v1124_v12 }
 0x1cd   : > { %1129 = vst [vmem:[%s229_s12] sm:$0xff] %v1127_v6 }
 0x1ce   : > { %1451 = shalt.err (!%p1448_p6)
}
 0x1cf   : > { %s1452_s30 = scalar_lea.hbm %s1143_s22, 128  ;;  %s1456_s10 = scalar_lea.hbm %s2222_s4, 256 }
 0x1d0   : > { %p1453_p10 = scmp.ne.s32.totalorder %s1143_s22, %s1452_s30  ;;  %p1457_p11 = scmp.lt.s32.totalorder %s1143_s22, %s2222_s4 }
 0x1d1   : > { %p1458_p13 = scmp.lt.s32.totalorder %s1456_s10, %s1452_s30 }
 0x1d2   : > { %p1454_p8 = pnand %p1453_p10, %p2239_p2 }
 0x1d3   : > { %p1459_p1 = por %p1458_p13, %p1457_p11 }
 0x1d4   : > { %p1455_p0 = pneg %p1454_p8 }
 0x1d6   : > { %p1460_p12 = pnand %p1459_p1, %p1455_p0 }
 0x1d8   : > { %1463 = shalt.err (!%p1460_p12)
}
 0x1d9   : > { %1307 = dma.vmem_to_hbm [thread:$0]  (%p2239_p2), %s1146_s13, 128, %s1143_s22, %s1131_s23  }
 0x1da PF: > { %p1329_p3 = scmp.ge.s32.totalorder %s1506_s18, 2  ;;  %s1157_s11 = sand.u32 1, %s1494_s15  }
 0x1db   : > { %p2240_p4 = scmp.ne.s32.totalorder %s2229_s26, 0  ;;  %s1158_s5 = scalar_lea.sflag [#allocation3], %s1157_s11 }
 0x1dd   : > { %p1320_p9 = pnand %p1329_p3, %p2240_p4 }
 0x1df   : > { %p1321_p7 = pneg %p1320_p9 }
 0x1e1   : > { %1489 = dma.done.wait (%p1321_p7), %s1158_s5, 128  }
 0x1e2   : > { %1491 = vsyncadd (%p1321_p7), %s1158_s5, 4294967168  ;;  %p16_p5 = scmp.ge.s32.totalorder %s1574_s21, 4   ;;  %s2241_s15 = smov %s1498_s16 }
 0x1e3   : > { %s2242_s16 = smov %s1502_s17  ;;  %s2243_s17 = smov %s1585_s24 }
 0x1e4   : > { %s2244_s18 = smov %s1574_s21  ;;  %18 = sbr.rel (!%p16_p5) target bundleno = 5 (0x5), region = 84 }
 0x1e9   :  { %1163 = vsyncpa [#allocation3], 1 }
 0x1ea   :  { %1165 = vsyncpa [#allocation3 + $0x1], 1 }
 0x1eb   :  { %1166 = vsyncpa [#allocation4], 1 }
 0x1ec   :  { %1168 = vsyncpa [#allocation4 + $0x1], 1 }
 0x1ed   :  { %1169 = vsyncpa [#allocation6], 1 }

</bundles_post_ra>
